<compile_context>
chip_gen: v7x
topology: tpu7x:2x2x1
jax: 0.10.0
libtpu: 0.0.40
codegen_flags: <defaults>
</compile_context>

<pallas_src>
import functools

import jax
import jax.numpy as jnp
from jax.experimental import pallas as pl
from jax.experimental.pallas import tpu as pltpu


def _round_up(x, m):
    return (x + m - 1) // m * m


def _choose_bag_tile(batch, requested):
    """Pick the per-step bag tile (multiple of 8, >= 2 grid steps if possible)."""
    bt = max(8, min(_round_up(requested, 8), _round_up(batch, 8)))
    # Prefer >= 2 batch steps so v7x megacore can shard the parallel axis
    # across both TensorCores (and the pipeline has something to overlap).
    if batch > 8 and _round_up(batch, bt) // bt < 2:
        bt = max(8, _round_up((batch + 1) // 2, 8))
    return bt


def _make_kernel(pad_idx):
    def embedding_bag_fc_kernel(ids_ref, w_ref, b_ref, out_ref, acc_ref):
        k = pl.program_id(1)                      # vocab-chunk (reduction) axis

        @pl.when(k == 0)
        def _():
            acc_ref[...] = jnp.zeros_like(acc_ref)

        ids = ids_ref[...]                        # (TB, S) int32
        TB, S = ids.shape
        TV = w_ref.shape[0]                       # vocab chunk size (mult of 128)
        v_base = k * TV

        # Per-bag vocabulary counts for this vocab chunk, accumulated in int32
        # over a short static loop on S, converted to bf16 once (exact: <= S).
        iota_v = jax.lax.broadcasted_iota(jnp.int32, (TB, TV), 1) + v_base
        counts = jnp.zeros((TB, TV), jnp.int32)
        for s in range(S):                        # static unroll, S is small
            counts = counts + (ids[:, s:s + 1] == iota_v).astype(jnp.int32)

        # Bag sum through the fused (emb @ W_fc^T) table: one bf16 MXU matmul.
        # (Padding row of the fused table is zero, so pad ids contribute 0.)
        acc_ref[...] += jnp.dot(counts.astype(w_ref.dtype), w_ref[...],
                                preferred_element_type=jnp.float32)

        @pl.when(k == pl.num_programs(1) - 1)
        def _():
            # Mean denominator straight from ids (tiny (TB, S) compare/reduce).
            bag_n = jnp.sum((ids != pad_idx).astype(jnp.int32),
                            axis=1, keepdims=True).astype(jnp.float32)
            inv_n = pl.reciprocal(jnp.maximum(bag_n, 1.0), approx=True)
            out_ref[...] = (acc_ref[...] * inv_n + b_ref[...]).astype(out_ref.dtype)

    return embedding_bag_fc_kernel


def prepare_params(emb_weight, fc_weight, fc_bias, *,
                   vocab_tile=512, weight_dtype=jnp.bfloat16):
    """One-time weight prep (hoisted out of the per-call hot path).

    emb_weight: (vocab_size + 1, D); fc_weight: (C, D); fc_bias: (C,).
    Returns lane-padded, pre-fused bf16 weights + metadata for the forward.
    """
    Vtot, D = emb_weight.shape                    # Vtot = vocab_size + 1
    C = fc_weight.shape[0]
    pad_idx = Vtot - 1                            # nn.EmbeddingBag padding_idx

    vt = max(128, _round_up(min(vocab_tile, Vtot), 128))   # multiple of 128
    Vp = _round_up(Vtot, vt)
    Cp = _round_up(C, 128)

    # Pre-fuse: out = ((counts @ emb) * inv_n) @ W^T + b
    #               = (counts @ (emb @ W^T)) * inv_n + b
    fused = emb_weight.astype(jnp.float32) @ fc_weight.astype(jnp.float32).T
    fused = fused.at[pad_idx, :].set(0.0)         # padding row contributes 0
    fused_p = jnp.zeros((Vp, Cp), weight_dtype).at[:Vtot, :C].set(
        fused.astype(weight_dtype))
    bias_p = jnp.zeros((1, Cp), jnp.float32).at[0, :C].set(
        fc_bias.astype(jnp.float32))

    return {
        "fused": fused_p, "bias": bias_p,
        "pad_idx": pad_idx, "num_class": C, "vocab_tile": vt,
    }


@functools.partial(jax.jit,
                   static_argnames=("pad_idx", "num_class", "vocab_tile",
                                    "bag_tile"))
def embedding_bag_model(ids, fused_p, bias_p, *, pad_idx, num_class,
                        vocab_tile, bag_tile=128):
    """ids: (B, S) int.  Returns (B, num_class) float32."""
    B, S = ids.shape
    Vp, Cp = fused_p.shape

    bt = _choose_bag_tile(B, bag_tile)
    Bp = _round_up(B, bt)
    ids_p = jnp.full((Bp, S), pad_idx, jnp.int32).at[:B, :].set(
        ids.astype(jnp.int32))

    grid = (Bp // bt, Vp // vocab_tile)           # (parallel bags, vocab reduction)
    out_p = pl.pallas_call(
        _make_kernel(pad_idx),
        out_shape=jax.ShapeDtypeStruct((Bp, Cp), jnp.float32),
        grid_spec=pltpu.PrefetchScalarGridSpec(
            num_scalar_prefetch=0,
            grid=grid,
            in_specs=[
                # ids tile: constant across the vocab axis (fetched once per i).
                pl.BlockSpec((bt, S), lambda i, k: (i, 0)),
                # Fused weight chunk: streamed / double-buffered over k.
                pl.BlockSpec((vocab_tile, Cp), lambda i, k: (k, 0)),
                # Bias: resident across the whole grid.
                pl.BlockSpec((1, Cp), lambda i, k: (0, 0)),
            ],
            out_specs=pl.BlockSpec((bt, Cp), lambda i, k: (i, 0)),
            scratch_shapes=[pltpu.VMEM((bt, Cp), jnp.float32)],
        ),
        compiler_params=pltpu.CompilerParams(
            dimension_semantics=("parallel", "arbitrary"),
            # Explicit scoped-VMEM budget: above v5e's 16 MiB default, safely
            # below v7x's 64 MiB physical VMEM.
            vmem_limit_bytes=48 * 1024 * 1024,
        ),
    )(ids_p, fused_p, bias_p)

    return out_p[:B, :num_class]


if __name__ == "__main__":
    # Small shapes consistent with the module.
    vocab_size = 32
    embedding_dim = 32
    num_class = 8
    B, S = 16, 16
    padding_idx = vocab_size  # nn.EmbeddingBag(vocab_size + 1, ..., padding_idx=vocab_size)

    key = jax.random.PRNGKey(0)
    k_ids, k_emb, k_fcw = jax.random.split(key, 3)

    # Deterministic init mirroring init_weights(): uniform(-0.5, 0.5), bias = 0.
    initrange = 0.5
    emb_weight = jax.random.uniform(
        k_emb, (vocab_size + 1, embedding_dim),
        minval=-initrange, maxval=initrange, dtype=jnp.float32)
    fc_weight = jax.random.uniform(
        k_fcw, (num_class, embedding_dim),
        minval=-initrange, maxval=initrange, dtype=jnp.float32)
    fc_bias = jnp.zeros((num_class,), dtype=jnp.float32)

    # Input ids in [0, vocab_size] so some entries hit the padding index.
    ids = jax.random.randint(k_ids, (B, S), 0, vocab_size + 1, dtype=jnp.int32)

    # One-time weight prep (padding/fusion hoisted out of the hot path).
    params = prepare_params(emb_weight, fc_weight, fc_bias)

    out = embedding_bag_model(
        ids, params["fused"], params["bias"],
        pad_idx=params["pad_idx"], num_class=params["num_class"],
        vocab_tile=params["vocab_tile"])
    out = jax.block_until_ready(out)

    # Pure-JAX reference (EmbeddingBag mean with padding_idx + Linear), f32.
    not_pad = (ids != padding_idx)
    gathered = emb_weight[ids] * not_pad[:, :, None].astype(jnp.float32)
    counts = jnp.sum(not_pad.astype(jnp.float32), axis=1, keepdims=True)
    mean_emb = jnp.where(counts > 0,
                         jnp.sum(gathered, axis=1) / jnp.maximum(counts, 1.0),
                         0.0)
    ref = mean_emb @ fc_weight.T + fc_bias

    assert out.shape == (B, num_class)
    # Tolerance accounts for bf16 fused-weight rounding and the approximate
    # EUP reciprocal used for the mean denominator.
    assert jnp.allclose(out, ref, atol=5e-3, rtol=5e-3), (
        float(jnp.max(jnp.abs(out - ref))))

    print("KERNEL_OK")
</pallas_src>

<mosaic_0001>
module attributes {stable_mosaic.version = 11 : i64} {
  func.func @embedding_bag_fc_kernel(%arg0: i32, %arg1: i32, %arg2: memref<8x16xi32, #tpu.memory_space<vmem>>, %arg3: memref<128x128xbf16, #tpu.memory_space<vmem>>, %arg4: memref<1x128xf32, #tpu.memory_space<vmem>>, %arg5: memref<8x128xf32, #tpu.memory_space<vmem>>, %arg6: memref<8x128xf32, #tpu.memory_space<vmem>>) attributes {dimension_semantics = [#tpu.dimension_semantics<parallel>, #tpu.dimension_semantics<arbitrary>], iteration_bounds = array<i64: 2, 1>, scalar_prefetch = 0 : i64, scratch_operands = 1 : i64, tpu.core_type = #tpu.core_type<tc>, window_params = [{transform_indices = @transform_0, window_bounds = array<i64: 8, 16>}, {transform_indices = @transform_1, window_bounds = array<i64: 128, 128>}, {pipeline_mode = #tpu.pipeline_mode<synchronous>, transform_indices = @transform_2, window_bounds = array<i64: 1, 128>}, {transform_indices = @transform_3, window_bounds = array<i64: 8, 128>}]} {
    %c0_i32 = arith.constant 0 : i32
    %0 = arith.cmpi eq, %arg1, %c0_i32 : i32
    %1 = arith.extui %0 : i1 to i32
    %c0_i32_0 = arith.constant 0 : i32
    %2 = arith.cmpi ne, %1, %c0_i32_0 : i32
    scf.if %2 {
      %cst_11 = arith.constant 0.000000e+00 : f32
      %98 = vector.broadcast %cst_11 : f32 to vector<8x128xf32>
      %c0_12 = arith.constant 0 : index
      %c0_13 = arith.constant 0 : index
      %99 = vector.load %arg6[%c0_12, %c0_13] : memref<8x128xf32, #tpu.memory_space<vmem>>, vector<8x128xf32>
      tpu.vector_store %arg6[%c0_12, %c0_13], %98 {strides = array<i32>} : memref<8x128xf32, #tpu.memory_space<vmem>>, vector<8x128xf32>,
    } else {
    }
    %c0 = arith.constant 0 : index
    %c0_1 = arith.constant 0 : index
    %3 = vector.load %arg2[%c0, %c0_1] : memref<8x16xi32, #tpu.memory_space<vmem>>, vector<8x16xi32>
    %c128_i32 = arith.constant 128 : i32
    %4 = arith.muli %arg1, %c128_i32 : i32
    %5 = tpu.iota {dimensions = array<i32: 1>} : vector<8x128xi32>
    %6 = vector.broadcast %4 : i32 to vector<8x128xi32>
    %7 = arith.addi %5, %6 : vector<8x128xi32>
    %c0_i32_2 = arith.constant 0 : i32
    %8 = vector.broadcast %c0_i32_2 : i32 to vector<8x128xi32>
    %9 = vector.extract_strided_slice %3 {offsets = [0, 0], sizes = [8, 1], strides = [1, 1]} : vector<8x16xi32> to vector<8x1xi32>
    %10 = vector.broadcast %9 : vector<8x1xi32> to vector<8x128xi32>
    %11 = arith.cmpi eq, %10, %7 : vector<8x128xi32>
    %12 = arith.extui %11 : vector<8x128xi1> to vector<8x128xi32>
    %13 = arith.addi %8, %12 : vector<8x128xi32>
    %14 = vector.extract_strided_slice %3 {offsets = [0, 1], sizes = [8, 1], strides = [1, 1]} : vector<8x16xi32> to vector<8x1xi32>
    %15 = vector.broadcast %14 : vector<8x1xi32> to vector<8x128xi32>
    %16 = arith.cmpi eq, %15, %7 : vector<8x128xi32>
    %17 = arith.extui %16 : vector<8x128xi1> to vector<8x128xi32>
    %18 = arith.addi %13, %17 : vector<8x128xi32>
    %19 = vector.extract_strided_slice %3 {offsets = [0, 2], sizes = [8, 1], strides = [1, 1]} : vector<8x16xi32> to vector<8x1xi32>
    %20 = vector.broadcast %19 : vector<8x1xi32> to vector<8x128xi32>
    %21 = arith.cmpi eq, %20, %7 : vector<8x128xi32>
    %22 = arith.extui %21 : vector<8x128xi1> to vector<8x128xi32>
    %23 = arith.addi %18, %22 : vector<8x128xi32>
    %24 = vector.extract_strided_slice %3 {offsets = [0, 3], sizes = [8, 1], strides = [1, 1]} : vector<8x16xi32> to vector<8x1xi32>
    %25 = vector.broadcast %24 : vector<8x1xi32> to vector<8x128xi32>
    %26 = arith.cmpi eq, %25, %7 : vector<8x128xi32>
    %27 = arith.extui %26 : vector<8x128xi1> to vector<8x128xi32>
    %28 = arith.addi %23, %27 : vector<8x128xi32>
    %29 = vector.extract_strided_slice %3 {offsets = [0, 4], sizes = [8, 1], strides = [1, 1]} : vector<8x16xi32> to vector<8x1xi32>
    %30 = vector.broadcast %29 : vector<8x1xi32> to vector<8x128xi32>
    %31 = arith.cmpi eq, %30, %7 : vector<8x128xi32>
    %32 = arith.extui %31 : vector<8x128xi1> to vector<8x128xi32>
    %33 = arith.addi %28, %32 : vector<8x128xi32>
    %34 = vector.extract_strided_slice %3 {offsets = [0, 5], sizes = [8, 1], strides = [1, 1]} : vector<8x16xi32> to vector<8x1xi32>
    %35 = vector.broadcast %34 : vector<8x1xi32> to vector<8x128xi32>
    %36 = arith.cmpi eq, %35, %7 : vector<8x128xi32>
    %37 = arith.extui %36 : vector<8x128xi1> to vector<8x128xi32>
    %38 = arith.addi %33, %37 : vector<8x128xi32>
    %39 = vector.extract_strided_slice %3 {offsets = [0, 6], sizes = [8, 1], strides = [1, 1]} : vector<8x16xi32> to vector<8x1xi32>
    %40 = vector.broadcast %39 : vector<8x1xi32> to vector<8x128xi32>
    %41 = arith.cmpi eq, %40, %7 : vector<8x128xi32>
    %42 = arith.extui %41 : vector<8x128xi1> to vector<8x128xi32>
    %43 = arith.addi %38, %42 : vector<8x128xi32>
    %44 = vector.extract_strided_slice %3 {offsets = [0, 7], sizes = [8, 1], strides = [1, 1]} : vector<8x16xi32> to vector<8x1xi32>
    %45 = vector.broadcast %44 : vector<8x1xi32> to vector<8x128xi32>
    %46 = arith.cmpi eq, %45, %7 : vector<8x128xi32>
    %47 = arith.extui %46 : vector<8x128xi1> to vector<8x128xi32>
    %48 = arith.addi %43, %47 : vector<8x128xi32>
    %49 = vector.extract_strided_slice %3 {offsets = [0, 8], sizes = [8, 1], strides = [1, 1]} : vector<8x16xi32> to vector<8x1xi32>
    %50 = vector.broadcast %49 : vector<8x1xi32> to vector<8x128xi32>
    %51 = arith.cmpi eq, %50, %7 : vector<8x128xi32>
    %52 = arith.extui %51 : vector<8x128xi1> to vector<8x128xi32>
    %53 = arith.addi %48, %52 : vector<8x128xi32>
    %54 = vector.extract_strided_slice %3 {offsets = [0, 9], sizes = [8, 1], strides = [1, 1]} : vector<8x16xi32> to vector<8x1xi32>
    %55 = vector.broadcast %54 : vector<8x1xi32> to vector<8x128xi32>
    %56 = arith.cmpi eq, %55, %7 : vector<8x128xi32>
    %57 = arith.extui %56 : vector<8x128xi1> to vector<8x128xi32>
    %58 = arith.addi %53, %57 : vector<8x128xi32>
    %59 = vector.extract_strided_slice %3 {offsets = [0, 10], sizes = [8, 1], strides = [1, 1]} : vector<8x16xi32> to vector<8x1xi32>
    %60 = vector.broadcast %59 : vector<8x1xi32> to vector<8x128xi32>
    %61 = arith.cmpi eq, %60, %7 : vector<8x128xi32>
    %62 = arith.extui %61 : vector<8x128xi1> to vector<8x128xi32>
    %63 = arith.addi %58, %62 : vector<8x128xi32>
    %64 = vector.extract_strided_slice %3 {offsets = [0, 11], sizes = [8, 1], strides = [1, 1]} : vector<8x16xi32> to vector<8x1xi32>
    %65 = vector.broadcast %64 : vector<8x1xi32> to vector<8x128xi32>
    %66 = arith.cmpi eq, %65, %7 : vector<8x128xi32>
    %67 = arith.extui %66 : vector<8x128xi1> to vector<8x128xi32>
    %68 = arith.addi %63, %67 : vector<8x128xi32>
    %69 = vector.extract_strided_slice %3 {offsets = [0, 12], sizes = [8, 1], strides = [1, 1]} : vector<8x16xi32> to vector<8x1xi32>
    %70 = vector.broadcast %69 : vector<8x1xi32> to vector<8x128xi32>
    %71 = arith.cmpi eq, %70, %7 : vector<8x128xi32>
    %72 = arith.extui %71 : vector<8x128xi1> to vector<8x128xi32>
    %73 = arith.addi %68, %72 : vector<8x128xi32>
    %74 = vector.extract_strided_slice %3 {offsets = [0, 13], sizes = [8, 1], strides = [1, 1]} : vector<8x16xi32> to vector<8x1xi32>
    %75 = vector.broadcast %74 : vector<8x1xi32> to vector<8x128xi32>
    %76 = arith.cmpi eq, %75, %7 : vector<8x128xi32>
    %77 = arith.extui %76 : vector<8x128xi1> to vector<8x128xi32>
    %78 = arith.addi %73, %77 : vector<8x128xi32>
    %79 = vector.extract_strided_slice %3 {offsets = [0, 14], sizes = [8, 1], strides = [1, 1]} : vector<8x16xi32> to vector<8x1xi32>
    %80 = vector.broadcast %79 : vector<8x1xi32> to vector<8x128xi32>
    %81 = arith.cmpi eq, %80, %7 : vector<8x128xi32>
    %82 = arith.extui %81 : vector<8x128xi1> to vector<8x128xi32>
    %83 = arith.addi %78, %82 : vector<8x128xi32>
    %84 = vector.extract_strided_slice %3 {offsets = [0, 15], sizes = [8, 1], strides = [1, 1]} : vector<8x16xi32> to vector<8x1xi32>
    %85 = vector.broadcast %84 : vector<8x1xi32> to vector<8x128xi32>
    %86 = arith.cmpi eq, %85, %7 : vector<8x128xi32>
    %87 = arith.extui %86 : vector<8x128xi1> to vector<8x128xi32>
    %88 = arith.addi %83, %87 : vector<8x128xi32>
    %c0_3 = arith.constant 0 : index
    %c0_4 = arith.constant 0 : index
    %89 = vector.load %arg6[%c0_3, %c0_4] : memref<8x128xf32, #tpu.memory_space<vmem>>, vector<8x128xf32>
    %90 = arith.sitofp %88 : vector<8x128xi32> to vector<8x128xbf16>
    %c0_5 = arith.constant 0 : index
    %c0_6 = arith.constant 0 : index
    %91 = vector.load %arg3[%c0_5, %c0_6] : memref<128x128xbf16, #tpu.memory_space<vmem>>, vector<128x128xbf16>
    %cst = arith.constant dense<0.000000e+00> : vector<8x128xf32>
    %92 = tpu.matmul %90, %91, %cst {dimension_numbers = #tpu.dot_dimension_numbers<[1], [0], [0], [1], [0, 0, 1, 1], [], []>} : vector<8x128xbf16>, vector<128x128xbf16>, vector<8x128xf32> -> vector<8x128xf32>
    %93 = arith.addf %89, %92 : vector<8x128xf32>
    %c0_7 = arith.constant 0 : index
    %c0_8 = arith.constant 0 : index
    %94 = vector.load %arg6[%c0_7, %c0_8] : memref<8x128xf32, #tpu.memory_space<vmem>>, vector<8x128xf32>
    tpu.vector_store %arg6[%c0_7, %c0_8], %93 {strides = array<i32>} : memref<8x128xf32, #tpu.memory_space<vmem>>, vector<8x128xf32>,
    %c0_i32_9 = arith.constant 0 : i32
    %95 = arith.cmpi eq, %arg1, %c0_i32_9 : i32
    %96 = arith.extui %95 : i1 to i32
    %c0_i32_10 = arith.constant 0 : i32
    %97 = arith.cmpi ne, %96, %c0_i32_10 : i32
    scf.if %97 {
      %c32_i32 = arith.constant 32 : i32
      %98 = vector.broadcast %c32_i32 : i32 to vector<8x16xi32>
      %99 = arith.cmpi ne, %3, %98 : vector<8x16xi32>
      %100 = arith.extui %99 : vector<8x16xi1> to vector<8x16xi32>
      %cst_11 = arith.constant dense<0> : vector<8xi32>
      %101 = vector.multi_reduction <add>, %100, %cst_11 [1] : vector<8x16xi32> to vector<8xi32>
      %102 = vector.shape_cast %101 : vector<8xi32> to vector<8x1xi32>
      %103 = arith.sitofp %102 : vector<8x1xi32> to vector<8x1xf32>
      %cst_12 = arith.constant 1.000000e+00 : f32
      %104 = vector.broadcast %cst_12 : f32 to vector<8x1xf32>
      %105 = arith.maximumf %103, %104 : vector<8x1xf32>
      %106 = tpu.reciprocal %105 {approx = true} : vector<8x1xf32> -> vector<8x1xf32>
      %c0_13 = arith.constant 0 : index
      %c0_14 = arith.constant 0 : index
      %107 = vector.load %arg6[%c0_13, %c0_14] : memref<8x128xf32, #tpu.memory_space<vmem>>, vector<8x128xf32>
      %108 = vector.broadcast %106 : vector<8x1xf32> to vector<8x128xf32>
      %109 = arith.mulf %107, %108 : vector<8x128xf32>
      %c0_15 = arith.constant 0 : index
      %c0_16 = arith.constant 0 : index
      %110 = vector.load %arg4[%c0_15, %c0_16] : memref<1x128xf32, #tpu.memory_space<vmem>>, vector<1x128xf32>
      %111 = vector.broadcast %110 : vector<1x128xf32> to vector<8x128xf32>
      %112 = arith.addf %109, %111 : vector<8x128xf32>
      %c0_17 = arith.constant 0 : index
      %c0_18 = arith.constant 0 : index
      %113 = vector.load %arg5[%c0_17, %c0_18] : memref<8x128xf32, #tpu.memory_space<vmem>>, vector<8x128xf32>
      tpu.vector_store %arg5[%c0_17, %c0_18], %112 {strides = array<i32>} : memref<8x128xf32, #tpu.memory_space<vmem>>, vector<8x128xf32>,
    } else {
    }
    return
  }
  func.func @transform_0(%arg0: i32, %arg1: i32) -> (i32, i32) {
    %c0_i32 = arith.constant 0 : i32
    %c0_i32_0 = arith.constant 0 : i32
    return %arg0, %c0_i32 : i32, i32
  }
  func.func @transform_1(%arg0: i32, %arg1: i32) -> (i32, i32) {
    %c0_i32 = arith.constant 0 : i32
    %c0_i32_0 = arith.constant 0 : i32
    return %arg1, %c0_i32 : i32, i32
  }
  func.func @transform_2(%arg0: i32, %arg1: i32) -> (i32, i32) {
    %c0_i32 = arith.constant 0 : i32
    %c0_i32_0 = arith.constant 0 : i32
    %c0_i32_1 = arith.constant 0 : i32
    return %c0_i32, %c0_i32_0 : i32, i32
  }
  func.func @transform_3(%arg0: i32, %arg1: i32) -> (i32, i32) {
    %c0_i32 = arith.constant 0 : i32
    %c0_i32_0 = arith.constant 0 : i32
    return %arg0, %c0_i32 : i32, i32
  }
}

</mosaic_0001>

<bundles_post_ra>
// kernel: embedding_bag_model.1
= control target key start
LH: loop header
LB: loop body
LE: loop exit
PB: predicated region body
PF: predicated region fallthrough
CT: control target
= control target key end

     0   :  { %8 = vsyncpa [#allocation4], 0  ;;  %s1089_s0 = inlined_call_operand.hbm [shape: s32[16,16], index: 0, kind: input, shape index: {}]   ;;  %s1090_s1 = inlined_call_operand.hbm [shape: bf16[128,128], index: 1, kind: input, shape index: {}]   ;;  %s1091_s2 = inlined_call_operand.vmem [shape: f32[1,128], index: 2, kind: input, shape index: {}]   ;;  %s1092_s3 = inlined_call_operand.vmem [shape: f32[16,128], index: 3, kind: output, shape index: {}]  }
   0x1   :  { %10 = vsyncpa [#allocation4 + $0x1], 0 }
   0x2   :  { %11 = vsyncpa [#allocation6], 0  ;;  %s876_s12 = smov 0   ;;  %s878_s13 = smov 0  }
   0x3   :  { %s880_s14 = smov 0   ;;  %s882_s15 = smov 0  }
   0x4   :  { %s884_s16 = smov 0   ;;  %s886_s17 = smov 0  }
   0x5 LB: > { %s556_s18 = sadd.s32 4294967295, %s832_s17   ;;  %p49_p0 = scmp.ne.s32.totalorder %s816_s13, %s812_s12  ;;  %s832_s17 = sphi %s886_s17, %s17_s17   ;;  %s828_s16 = sphi %s884_s16, %s1109_s16   ;;  %s824_s15 = sphi %s882_s15, %s1108_s15   ;;  %s820_s14 = sphi %s880_s14, %s1107_s14   ;;  %s816_s13 = sphi %s878_s13, %s1106_s13   ;;  %s812_s12 = sphi %s876_s12, %s1105_s12  }
   0x6   : > { %p906_p1 = scmp.eq.s32.totalorder %s556_s18, 0  ;;  %p558_p2 = scmp.ge.s32.totalorder %s832_s17, 1 }
   0x7   : > { %p133_p3 = scmp.lt.s32.totalorder %s832_s17, 3  ;;  %s834_s22 = smov [#allocation5]  }
   0x8   : > { %s1097_s19 = scalar_select %p906_p1, 1, 0 }
   0x9   : > { %p914_p4 = por %p906_p1, %p49_p0  ;;  %p918_p5 = pnand %p558_p2, %p133_p3 }
   0xa   : > { %s148_s23 = sshll.u32 %s834_s22, 4  ;;  %s29_s25 = sadd.s32 1, %s828_s16  ;;  %s149_s23 = int_to_ptr.vmem [resolvable:$true] %s148_s23 }
   0xb   : > { %s1098_s20 = scalar_select %p914_p4, 1, 0 }
   0xc   : > { %s1099_s21 = scalar_select %p918_p5, 1, 0 }
   0xd   : > { %p613_p6 = pneg %p918_p5  ;;  %s720_s28 = scalar_lea.hbm %s1090_s1, 1024 }
   0xe   : > { %p721_p8 = scmp.ne.s32.totalorder %s1090_s1, %s720_s28  ;;  %p727_p12 = scmp.lt.u32.totalorder %s720_s28, %s1090_s1 }
   0xf   : > { %p926_p7 = pnand %p613_p6, %p906_p1 }
  0x11   : > { %p722_p9 = pneg %p926_p7 }
  0x13   : > { %p723_p10 = pnand %p722_p9, %p721_p8 }
  0x15   : > { %p724_p11 = pneg %p723_p10 }
  0x17   : > { %p729_p13 = pnand %p727_p12, %p724_p11 }
  0x19   : > { %732 = shalt.err (!%p729_p13)
}
  0x1a   : > { %s733_s6 = scalar_lea.vmem %s149_s23, 1024  ;;  %p741_p6 = scmp.lt.s32.totalorder %s149_s23, %s149_s23 }
  0x1b   : > { %p734_p0 = scmp.ne.s32.totalorder %s149_s23, %s733_s6  ;;  %p742_p1 = scmp.lt.s32.totalorder %s733_s6, %s733_s6 }
  0x1d   : > { %p736_p2 = pnand %p734_p0, %p722_p9  ;;  %p743_p4 = por %p742_p1, %p741_p6 }
  0x1f   : > { %p737_p3 = pneg %p736_p2 }
  0x21   : > { %p744_p5 = pnand %p743_p4, %p737_p3 }
  0x23   : > { %747 = shalt.err (!%p744_p5)
}
  0x24   : > { %s835_s7 = smov 64   ;;  %s836_s8 = smov 4  }
  0x25   : > { %616 = dma.hbm_to_vmem [thread:$0]  (!%p926_p7), %s1090_s1, 1024, %s149_s23, [#allocation6], %s835_s7, %s835_s7, %s836_s8  }
  0x26   : > { %p31_p1 = scmp.ge.s32.totalorder %s29_s25, 2  ;;  %s36_s11 = sadd.s32 1, %s820_s14 }
  0x27   : > { %p43_p4 = scmp.ne.s32.totalorder %s820_s14, %s816_s13  ;;  %p44_p5 = scmp.eq.s32.totalorder %s832_s17, 0 }
  0x28   : > { %s1111_s25 = smov (%p31_p1, %s29_s25), 0  ;;  %p622_p9 = scmp.lt.s32.totalorder %s832_s17, 2 }
  0x29   : > { %p45_p8 = por %p44_p5, %p43_p4  ;;  %s33_s12 = ssub.s32 %s828_s16, %s1111_s25 }
  0x2a   : > { %s165_s18 = sand.u32 1, %s820_s14   ;;  %p34_p10 = scmp.eq.s32.totalorder %s33_s12, 0 }
  0x2b   : > { %s561_s22 = sshll.u32 %s165_s18, 3  ;;  %s562_s26 = sshll.u32 %s828_s16, 7 }
  0x2c   : > { %s959_s27 = scalar_select %p34_p10, %s820_s14, %s36_s11  }
  0x2d   : > { %s964_s23 = scalar_lea.hbm %s1089_s0, %s562_s26  ;;  %s169_s29 = scalar_lea.vmem [#allocation3], %s561_s22 }
  0x2e   : > { %s176_s30 = sshll.u32 %s169_s29, 4  ;;  %p966_p7 = pnand %p622_p9, %p45_p8  ;;  %s970_s30 = int_to_ptr.vmem [resolvable:$true] %s176_s30 }
  0x2f   : > { %s166_s5 = scalar_lea.sflag [#allocation4], %s165_s18  ;;  %s748_s6 = scalar_lea.hbm %s964_s23, 128 }
  0x30   : > { %p749_p11 = scmp.ne.s32.totalorder %s964_s23, %s748_s6  ;;  %p750_p12 = pneg %p966_p7 }
  0x31   : > { %s753_s9 = scalar_lea.hbm %s1089_s0, 256  ;;  %p754_p2 = scmp.lt.u32.totalorder %s964_s23, %s1089_s0 }
  0x32   : > { %p751_p13 = pnand %p750_p12, %p749_p11  ;;  %p755_p3 = scmp.lt.u32.totalorder %s753_s9, %s748_s6 }
  0x33   : > { %p757_p1 = scmp.lt.u32.totalorder %s748_s6, %s964_s23 }
  0x34   : > { %p752_p0 = pneg %p751_p13  ;;  %p756_p6 = por %p755_p3, %p754_p2 }
  0x36   : > { %p758_p4 = por %p757_p1, %p756_p6 }
  0x38   : > { %p759_p5 = pnand %p758_p4, %p752_p0 }
  0x3a   : > { %762 = shalt.err (!%p759_p5)
}
  0x3b   : > { %s763_s12 = scalar_lea.vmem %s970_s30, 128  ;;  %s837_s18 = smov [#allocation3]  }
  0x3c   : > { %p764_p8 = scmp.ne.s32.totalorder %s970_s30, %s763_s12  ;;  %s768_s22 = sshll.u32 %s837_s18, 4  ;;  %s769_s22 = int_to_ptr.vmem [resolvable:$false] %s768_s22 }
  0x3d   : > { %s770_s26 = scalar_lea.vmem %s769_s22, 256  ;;  %p771_p11 = scmp.lt.s32.totalorder %s970_s30, %s769_s22 }
  0x3e   : > { %p766_p9 = pnand %p764_p8, %p750_p12  ;;  %p772_p13 = scmp.lt.s32.totalorder %s770_s26, %s763_s12 }
  0x40   : > { %p767_p10 = pneg %p766_p9  ;;  %p773_p2 = por %p772_p13, %p771_p11 }
  0x42   : > { %p774_p3 = pnand %p773_p2, %p767_p10 }
  0x44   : > { %777 = shalt.err (!%p774_p3)
}
  0x45   : > { %620 = dma.hbm_to_vmem [thread:$0]  (!%p966_p7), %s964_s23, 128, %s970_s30, %s166_s5  }
  0x46   : > { %p1102_p0 = scmp.ne.s32.totalorder %s1099_s21, 0 }
  0x47   : > { %s187_s24 = sand.u32 (!%p1102_p0), 1, %s816_s13   ;;  %p1103_p12 = scmp.ne.s32.totalorder (!%p1102_p0), %s1098_s20, 0 }
  0x48   : > { %185 = sbr.rel (%p1102_p0) target bundleno = 483 (0x1e3), region = 32  ;;  %s564_s28 = sshll.u32 (!%p1102_p0), %s187_s24, 3 }
  0x49   : > { %s188_s29 = scalar_lea.sflag (!%p1102_p0), [#allocation4], %s187_s24  ;;  %s191_s6 = scalar_lea.vmem (!%p1102_p0), [#allocation3], %s564_s28 }
  0x4f   : > { %803 = dma.done.wait (%p1103_p12), %s188_s29, 128  }
  0x50   : > { %805 = vsyncadd (%p1103_p12), %s188_s29, 4294967168  ;;  %p1104_p6 = scmp.ne.s32.totalorder %s1097_s19, 0 }
  0x52   : > { %807 = dma.done.wait (%p1104_p6), [#allocation6], 1024  }
  0x53   : > { %809 = vsyncadd (%p1104_p6), [#allocation6], 4294966272  ;;  %v838_v0 = vmov 2   ;;  %v839_v1 = vmov 0   ;;  %v1009_v2 = vld [vmem:[%s191_s6] sm:$0xff]  ;;  %v840_v3 = vmov 3   ;;  %v230_v32 = vlaneseq }
  0x54   : > { %695 = vset.pattern.permute.xlu1 %v838_v0  ;;  %693 = vset.pattern.permute.xlu0 %v839_v1  ;;  %v841_v4 = vmov 1   ;;  %v842_v5 = vmov 4   ;;  %v843_v6 = vmov 5   ;;  %v844_v7 = vmov 6   ;;  %v710_v11 = vld [vmem:[#allocation5] sm:$0xff]   ;;  %v711_v15 = vld [vmem:[#allocation5 + $0x8] sm:$0xff]  }
  0x55   : > { %246 = vperm.xlu1 %695, %v1009_v2   ;;  %235 = vperm.xlu0 %693, %v1009_v2   ;;  %v845_v8 = vmov 8   ;;  %v846_v9 = vmov 7   ;;  %v847_v10 = vmov 11   ;;  %v848_v12 = vmov 0.0   ;;  %v712_v16 = vld [vmem:[#allocation5 + $0x10] sm:$0xff]   ;;  %v713_v19 = vld [vmem:[#allocation5 + $0x18] sm:$0xff]  }
  0x56   : > { %587 = vmatprep.subr.bf16.mxu0 %v848_v12  ;;  %v849_v13 = vmov 9   ;;  %v850_v14 = vmov 14   ;;  %v851_v17 = vmov 10   ;;  %v852_v18 = vmov 15   ;;  %v714_v21 = vld [vmem:[#allocation5 + $0x20] sm:$0xff]   ;;  %v715_v23 = vld [vmem:[#allocation5 + $0x28] sm:$0xff]  }
  0x57   : > { %588 = vmatpush3.bf16.msra.mxu0 %v710_v11  ;;  %v853_v20 = vmov 12   ;;  %v854_v22 = vmov 13   ;;  %v716_v24 = vld [vmem:[#allocation5 + $0x30] sm:$0xff]   ;;  %v717_v25 = vld [vmem:[#allocation5 + $0x38] sm:$0xff]   ;;  %vm855_vm0 = vmmov 0   ;;  %vm441_vm1 = vcmp.ne.s32.totalorder %v1009_v2, 32 }
  0x58   : > { %589 = vmatprep.subr.bf16.mxu0 %v848_v12  ;;  %603 = vmatprep.mubr.msk.bf16.mxu0 %vm855_vm0, %v848_v12  ;;  %vm443_vm2 = vcmask 130048   ;;  %v442_v26 = vsel %vm441_vm1, 1, %v839_v1  ;;  %v1029_v33 = vand.u32 127, %v230_v32  ;;  %p218_p7 = scmp.lt.s32.totalorder %s824_s15, 1 }
  0x59   : > { %696 = vset.pattern.permute.xlu1 %v840_v3  ;;  %694 = vset.pattern.permute.xlu0 %v841_v4  ;;  %v444_v27 = vsel %vm443_vm2, %v442_v26, 0 }
  0x5a   : > { %252 = vperm.xlu1 %696, %v1009_v2   ;;  %240 = vperm.xlu0 %694, %v1009_v2   ;;  %v445_v28 = vand.u32 65535, %v444_v27  ;;  %v446_v30 = vshrl.u32 %v444_v27, 16  ;;  %s1113_s15 = smov (!%p218_p7, %s824_s15), 1 }
  0x5b   : > { %590 = vmatpush3.bf16.msra.mxu0 %v711_v15  ;;  %s566_s19 = sshll.u32 %s1113_s15, 3 }
  0x5c   : > { %591 = vmatprep.subr.bf16.mxu0 %v848_v12  ;;  %v447_v29 = vcvt.s32.f32 %v445_v28  ;;  %v448_v31 = vcvt.s32.f32 %v446_v30  ;;  %s221_s4 = scalar_lea.vmem %s1092_s3, %s566_s19 }
  0x5e   : > { %697 = vset.pattern.permute.xlu1 %v842_v5  ;;  %698 = vset.pattern.permute.xlu0 %v843_v6 }
  0x5f   : > { %258 = vperm.xlu1 %697, %v1009_v2   ;;  %264 = vperm.xlu0 %698, %v1009_v2  }
  0x60   : > { %592 = vmatpush3.bf16.msra.mxu0 %v712_v16 }
  0x61   : > { %593 = vmatprep.subr.bf16.mxu0 %v848_v12 }
  0x63   : > { %699 = vset.pattern.permute.xlu1 %v844_v7  ;;  %701 = vset.pattern.permute.xlu0 %v845_v8 }
  0x64   : > { %270 = vperm.xlu1 %699, %v1009_v2   ;;  %282 = vperm.xlu0 %701, %v1009_v2  }
  0x65   : > { %594 = vmatpush3.bf16.msra.mxu0 %v713_v19 }
  0x66   : > { %595 = vmatprep.subr.bf16.mxu0 %v848_v12 }
  0x68   : > { %700 = vset.pattern.permute.xlu1 %v846_v9  ;;  %704 = vset.pattern.permute.xlu0 %v847_v10 }
  0x69   : > { %276 = vperm.xlu1 %700, %v1009_v2   ;;  %300 = vperm.xlu0 %704, %v1009_v2  }
  0x6a   : > { %596 = vmatpush3.bf16.msra.mxu0 %v714_v21 }
  0x6b   : > { %597 = vmatprep.subr.bf16.mxu0 %v848_v12 }
  0x6d   : > { %702 = vset.pattern.permute.xlu1 %v849_v13  ;;  %707 = vset.pattern.permute.xlu0 %v850_v14 }
  0x6e   : > { %288 = vperm.xlu1 %702, %v1009_v2   ;;  %318 = vperm.xlu0 %707, %v1009_v2  }
  0x6f   : > { %598 = vmatpush3.bf16.msra.mxu0 %v715_v23 }
  0x70   : > { %599 = vmatprep.subr.bf16.mxu0 %v848_v12 }
  0x72   : > { %703 = vset.pattern.permute.xlu1 %v851_v17  ;;  %709 = vset.pattern.permute.xlu0 %v852_v18 }
  0x73   : > { %294 = vperm.xlu1 %703, %v1009_v2   ;;  %600 = vmatpush3.bf16.msra.mxu0 %v716_v24 }
  0x74   : > { %601 = vmatprep.subr.bf16.mxu0 %v848_v12 }
  0x77   : > { %705 = vset.pattern.permute.xlu1 %v853_v20  ;;  %602 = vmatpush3.bf16.msra.mxu0 %v717_v25 }
  0x78   : > { %306 = vperm.xlu1 %705, %v1009_v2  }
  0x7c   : > { %706 = vset.pattern.permute.xlu1 %v854_v22 }
  0x7d   : > { %312 = vperm.xlu1 %706, %v1009_v2  }
  0x81   : > { %708 = vset.pattern.permute.xlu1 %v852_v18 }
  0x82   : > { %324 = vperm.xlu1 %708, %v1009_v2  }
  0x8d   : > { %449 = vadd.xlane.f32.xlu0 %v447_v29 }
  0xa6   : > { %451 = vadd.xlane.f32.xlu1 %v448_v31 }
  0xd4   : > { %v247_v34 = vpop.permute.xlu1 %246  ;;  %v236_v35 = vpop.permute.xlu0 %235 }
  0xd5   : > { %vm237_vm3 = vcmp.eq.s32.totalorder %v236_v35, %v1029_v33  ;;  %vm248_vm4 = vcmp.eq.s32.totalorder %v247_v34, %v1029_v33 }
  0xd6   : > { %v238_v36 = vsel %vm237_vm3, 1, %v839_v1  ;;  %v249_v41 = vsel %vm248_vm4, 1, %v839_v1 }
  0xd9   : > { %v253_v37 = vpop.permute.xlu1 %252  ;;  %v241_v38 = vpop.permute.xlu0 %240 }
  0xda   : > { %vm242_vm5 = vcmp.eq.s32.totalorder %v241_v38, %v1029_v33  ;;  %vm254_vm6 = vcmp.eq.s32.totalorder %v253_v37, %v1029_v33 }
  0xdb   : > { %v243_v39 = vsel %vm242_vm5, 1, %v839_v1  ;;  %v255_v45 = vsel %vm254_vm6, 1, %v839_v1 }
  0xdc   : > { %v244_v40 = vadd.s32 %v243_v39, %v238_v36 }
  0xde   : > { %v250_v42 = vadd.s32 %v249_v41, %v244_v40  ;;  %v259_v43 = vpop.permute.xlu1 %258  ;;  %v265_v44 = vpop.permute.xlu0 %264 }
  0xdf   : > { %vm260_vm7 = vcmp.eq.s32.totalorder %v259_v43, %v1029_v33  ;;  %vm266_vm8 = vcmp.eq.s32.totalorder %v265_v44, %v1029_v33 }
  0xe0   : > { %v256_v46 = vadd.s32 %v255_v45, %v250_v42  ;;  %v261_v47 = vsel %vm260_vm7, 1, %v839_v1  ;;  %v267_v49 = vsel %vm266_vm8, 1, %v839_v1 }
  0xe2   : > { %v262_v48 = vadd.s32 %v261_v47, %v256_v46 }
  0xe3   : > { %v271_v50 = vpop.permute.xlu1 %270  ;;  %v283_v53 = vpop.permute.xlu0 %282 }
  0xe4   : > { %vm272_vm9 = vcmp.eq.s32.totalorder %v271_v50, %v1029_v33  ;;  %v268_v51 = vadd.s32 %v267_v49, %v262_v48  ;;  %vm284_vm11 = vcmp.eq.s32.totalorder %v283_v53, %v1029_v33 }
  0xe5   : > { %v273_v52 = vsel %vm272_vm9, 1, %v839_v1  ;;  %v285_v58 = vsel %vm284_vm11, 1, %v839_v1 }
  0xe6   : > { %v274_v55 = vadd.s32 %v273_v52, %v268_v51 }
  0xe8   : > { %v277_v54 = vpop.permute.xlu1 %276  ;;  %v301_v62 = vpop.permute.xlu0 %300 }
  0xe9   : > { %vm278_vm10 = vcmp.eq.s32.totalorder %v277_v54, %v1029_v33  ;;  %vm302_vm14 = vcmp.eq.s32.totalorder %v301_v62, %v1029_v33 }
  0xea   : > { %v279_v56 = vsel %vm278_vm10, 1, %v839_v1  ;;  %v303_v4 = vsel %vm302_vm14, 1, %v839_v1 }
  0xeb   : > { %v280_v57 = vadd.s32 %v279_v56, %v274_v55 }
  0xed   : > { %v289_v59 = vpop.permute.xlu1 %288  ;;  %v286_v60 = vadd.s32 %v285_v58, %v280_v57  ;;  %v319_v6 = vpop.permute.xlu0 %318 }
  0xee   : > { %vm290_vm12 = vcmp.eq.s32.totalorder %v289_v59, %v1029_v33  ;;  %vm320_vm0 = vcmp.eq.s32.totalorder %v319_v6, %v1029_v33 }
  0xef   : > { %v291_v61 = vsel %vm290_vm12, 1, %v839_v1  ;;  %v321_v12 = vsel %vm320_vm0, 1, %v839_v1 }
  0xf0   : > { %v292_v0 = vadd.s32 %v291_v61, %v286_v60 }
  0xf2   : > { %v295_v63 = vpop.permute.xlu1 %294 }
  0xf3   : > { %vm296_vm13 = vcmp.eq.s32.totalorder %v295_v63, %v1029_v33 }
  0xf4   : > { %v297_v2 = vsel %vm296_vm13, 1, %v839_v1 }
  0xf5   : > { %v298_v3 = vadd.s32 %v297_v2, %v292_v0 }
  0xf7   : > { %v307_v5 = vpop.permute.xlu1 %306  ;;  %v304_v7 = vadd.s32 %v303_v4, %v298_v3 }
  0xf8   : > { %vm308_vm15 = vcmp.eq.s32.totalorder %v307_v5, %v1029_v33 }
  0xf9   : > { %v309_v8 = vsel %vm308_vm15, 1, %v839_v1 }
  0xfa   : > { %v310_v10 = vadd.s32 %v309_v8, %v304_v7 }
  0xfc   : > { %v313_v9 = vpop.permute.xlu1 %312 }
  0xfd   : > { %vm314_vm1 = vcmp.eq.s32.totalorder %v313_v9, %v1029_v33 }
  0xfe   : > { %v315_v11 = vsel %vm314_vm1, 1, %v839_v1 }
  0xff   : > { %v316_v13 = vadd.s32 %v315_v11, %v310_v10 }
 0x101   : > { %v322_v14 = vadd.s32 %v321_v12, %v316_v13  ;;  %v325_v15 = vpop.permute.xlu1 %324 }
 0x102   : > { %vm326_vm2 = vcmp.eq.s32.totalorder %v325_v15, %v1029_v33 }
 0x103   : > { %v327_v16 = vsel %vm326_vm2, 1, %v839_v1  ;;  %v575_v1 = vld [vmem:[%s1091_s2] ss:$0 sm:$0xff] }
 0x104   : > { %v328_v17 = vadd.s32 %v327_v16, %v322_v14 }
 0x106   : > { %v330_v18 = vcvt.s32.f32 %v328_v17 }
 0x108   : > { %v331_v19 = vpack.c.bf16 %v330_v18, %v330_v18 }
 0x10a   : > { %604 = vmatmul.mubr.bf16.vlgmr.msra.gmra.mrb[0].mxu0 %v331_v19 }
 0x11a   : > { %v450_v22 = vpop.xlane.xlu0 %449 }
 0x11b   : > { %v453_v24 = vcvt.f32.s32 %v450_v22 }
 0x133   : > { %v452_v20 = vpop.xlane.xlu1 %451 }
 0x134   : > { %v454_v21 = vcvt.f32.s32 %v452_v20 }
 0x136   : > { %v455_v23 = vshll.u32 %v454_v21, 16 }
 0x138   : > { %v456_v25 = vadd.s32 %v455_v23, %v453_v24 }
 0x13a   : > { %v457_v26 = vcvt.s32.f32 %v456_v25 }
 0x13c   : > { %v458_v27 = vmax.f32 %v457_v26, 1.0 }
 0x13e   : > { %718 = vrcp.f32 %v458_v27 }
 0x148   : > { %v719_v28 = vpop.eup %718 }
 0x1dd   : > { %v430_v29 = vpop.f32.mrb[0].mxu0 }
 0x1de   : > { %v461_v30 = vmul.f32 %v719_v28, %v430_v29  ;;  %v605_v31 = vpop.f32.mrb[1].mxu0 }
 0x1df   : > { %v433_v32 = vpop.f32.mrb[2].mxu0 }
 0x1e0   : > { %v469_v33 = vadd.f32 %v575_v1, %v461_v30  ;;  %v606_v34 = vpop.f32.mrb[3].mxu0 }
 0x1e2   : > { %470 = vst [vmem:[%s221_s4] sm:$0xff] %v469_v33 }
 0x1e3 PF: > { %s17_s17 = sadd.s32 1, %s832_s17   ;;  %s1105_s12 = smov %s816_s13 }
 0x1e4   : > { %p14_p1 = scmp.ge.s32.totalorder %s17_s17, 4   ;;  %s1106_s13 = smov %s820_s14 }
 0x1e5   : > { %s1107_s14 = smov %s959_s27  ;;  %s1108_s15 = smov %s828_s16 }
 0x1e6   : > { %s1109_s16 = smov %s1111_s25  ;;  %16 = sbr.rel (!%p14_p1) target bundleno = 5 (0x5), region = 85 }
 0x1ed   :  { %490 = vsyncpa [#allocation4], 1 }
 0x1ee   :  { %492 = vsyncpa [#allocation4 + $0x1], 1 }
 0x1ef   :  { %493 = vsyncpa [#allocation6], 1 }

</bundles_post_ra>
